<compile_context>
chip_gen: v5e
topology: v5e:2x2
jax: 0.10.0
libtpu: 0.0.40
codegen_flags: <defaults>
</compile_context>

<pallas_src>
import math

import jax
import jax.numpy as jnp
from jax.experimental import pallas as pl
from jax.experimental.pallas import tpu as pltpu

EMB_SIZE = 4
REL_HIDDENS = (16, 16)
MLP_HIDDENS = (16,)
NUM_GOALS = 1
OBJECT_SIZE = 3
NEG_SLOPE = 0.01          # PyTorch nn.LeakyReLU default
HIDDEN = 16               # H1 == H2 == HM == 16 for the default config


def _leaky_relu(x):
    # single vmax per vreg instead of compare+select (valid since NEG_SLOPE > 0)
    return jnp.maximum(x, NEG_SLOPE * x)


def _round_up(x, m):
    return ((x + m - 1) // m) * m


# ---------------------------------------------------------------------------
# Kernel
# ---------------------------------------------------------------------------
def relation_kernel(x_ref, w_ref, b_ref, out_ref):
    """Fused relation + MLP forward for one batch tile (batch on lanes).

    x_ref:   (N, 3, TB)  per-object observations
    w_ref:   (4, H, H)   [0]=W1_own_x^T (cols 0:3), [1]=W1_obj_x^T (cols 0:3),
                         [2]=W2^T, [3]=W3^T
    b_ref:   (H, N+2)    cols 0..N-1 = fused per-object bias1, col N = b2, col N+1 = b3
    out_ref: (H, TB)
    """
    num_obj = x_ref.shape[0]

    w1_own = w_ref[0, :, 0:OBJECT_SIZE]            # (H, 3)
    w1_obj = w_ref[1, :, 0:OBJECT_SIZE]            # (H, 3)
    w2t = w_ref[2]                                 # (H, H)
    w3t = w_ref[3]                                 # (H, H)
    b2 = b_ref[:, num_obj:num_obj + 1]             # (H, 1)
    b3 = b_ref[:, num_obj + 1:num_obj + 2]         # (H, 1)

    # The "own" half of every relation row is identical across objects: compute once.
    own = jnp.dot(w1_own, x_ref[0], preferred_element_type=jnp.float32)   # (H, TB)

    acc = jnp.zeros_like(own)
    for n in range(num_obj):                       # N is tiny (e.g. 5) -> fully unrolled
        h1 = own + jnp.dot(w1_obj, x_ref[n], preferred_element_type=jnp.float32)
        h1 = _leaky_relu(h1 + b_ref[:, n:n + 1])   # fused bias1[n] (embeddings folded in)
        h2 = jnp.dot(w2t, h1, preferred_element_type=jnp.float32) + b2
        acc = acc + _leaky_relu(h2)                # object-sum as vreg accumulation

    out = jnp.dot(w3t, acc, preferred_element_type=jnp.float32) + b3
    out_ref[...] = _leaky_relu(out)                # lane-dense (H, TB) store


def run_relation_pallas(x_t, w_pack, b_pack, *, block_b):
    """x_t: (N, 3, B_pad) float32, B_pad divisible by block_b (>=128)."""
    num_obj, obj_size, b_pad = x_t.shape
    hidden = w_pack.shape[1]
    grid = (b_pad // block_b,)
    return pl.pallas_call(
        relation_kernel,
        out_shape=jax.ShapeDtypeStruct((hidden, b_pad), jnp.float32),
        grid=grid,
        in_specs=[
            pl.BlockSpec((num_obj, obj_size, block_b), lambda i: (0, 0, i)),
            pl.BlockSpec(w_pack.shape, lambda i: (0, 0, 0)),   # resident weights
            pl.BlockSpec(b_pack.shape, lambda i: (0, 0)),      # resident biases
        ],
        out_specs=pl.BlockSpec((hidden, block_b), lambda i: (0, i)),
        compiler_params=pltpu.CompilerParams(
            dimension_semantics=("parallel",)),                # shard batch tiles across TCs
    )(x_t, w_pack, b_pack)


# ---------------------------------------------------------------------------
# Wrapper (parameter folding + layout glue stays in plain JAX)
# ---------------------------------------------------------------------------
def _pack_params(params, num_objects):
    """Fold embeddings + duplicated 'own' columns of W1 into 2 packed tensors."""
    h1, h2 = REL_HIDDENS
    hm = MLP_HIDDENS[0]
    assert h1 == h2 == hm == HIDDEN, "packing assumes equal hidden sizes"

    w1 = params["w1"]                                   # (2*(3+E), H), rows: own_x|own_emb|obj_x|obj_emb
    e = EMB_SIZE
    w1_own_x = w1[0:OBJECT_SIZE]                        # (3, H)
    w1_own_e = w1[OBJECT_SIZE:OBJECT_SIZE + e]          # (E, H)
    w1_obj_x = w1[OBJECT_SIZE + e:2 * OBJECT_SIZE + e]  # (3, H)
    w1_obj_e = w1[2 * OBJECT_SIZE + e:]                 # (E, H)

    non_subgoals = 2 + NUM_GOALS
    emb_list = ([params["own_emb"], params["agent_emb"]]
                + [params["subgoal_emb"]] * (num_objects - non_subgoals)
                + [params["goal_emb"]])                 # num_goals == 1; goal2_embedding unused
    emb = jnp.stack(emb_list, axis=0)                   # (N, E)

    # Fused per-object bias: b1 + own_emb @ W1_own_emb + emb_n @ W1_obj_emb
    bias1 = params["own_emb"] @ w1_own_e + emb @ w1_obj_e + params["b1"][0]   # (N, H)

    w_pack = jnp.zeros((4, HIDDEN, HIDDEN), jnp.float32)
    w_pack = w_pack.at[0, :, :OBJECT_SIZE].set(w1_own_x.T)
    w_pack = w_pack.at[1, :, :OBJECT_SIZE].set(w1_obj_x.T)
    w_pack = w_pack.at[2].set(params["w2"].T)
    w_pack = w_pack.at[3].set(params["w3"].T)

    b_pack = jnp.concatenate([bias1.T, params["b2"].T, params["b3"].T], axis=1)  # (H, N+2)
    return w_pack, b_pack


def relation_layer_forward(x, params, block_b=1024):
    """Mirrors RelationLayer.forward.  x: (..., num_objects * 3) float32."""
    lead = x.shape[:-1]
    num_objects = x.shape[-1] // OBJECT_SIZE
    batch = math.prod(lead) if lead else 1

    w_pack, b_pack = _pack_params(params, num_objects)

    # (B, N, 3) -> (N, 3, B): batch on the lane (fast) axis; kernel sees only the raw
    # observations (embeddings / duplicated "own" half already folded into w_pack/b_pack).
    x_obj = x.reshape(batch, num_objects, OBJECT_SIZE)
    x_t = jnp.transpose(x_obj, (1, 2, 0))

    tb = min(block_b, _round_up(batch, 128))            # lane-aligned batch tile (sweepable)
    b_pad = _round_up(batch, tb)
    if b_pad != batch:
        x_t = jnp.pad(x_t, ((0, 0), (0, 0), (0, b_pad - batch)))

    out_t = run_relation_pallas(x_t, w_pack, b_pack, block_b=tb)   # (H, B_pad)
    out = out_t[:, :batch].T                                       # (B, H)
    return out.reshape(lead + (MLP_HIDDENS[-1],))


# ---------------------------------------------------------------------------
# Parameters & pure-JAX reference
# ---------------------------------------------------------------------------
def xavier_uniform(key, fan_in, fan_out):
    limit = math.sqrt(6.0 / (fan_in + fan_out))
    # stored as (in, out) so the math is x @ W
    return jax.random.uniform(key, (fan_in, fan_out), jnp.float32, -limit, limit)


def init_params(key):
    ks = jax.random.split(key, 8)
    in_size = 2 * (EMB_SIZE + OBJECT_SIZE)  # 14
    h1, h2 = REL_HIDDENS
    hm = MLP_HIDDENS[0]
    return {
        "own_emb": jax.random.normal(ks[0], (EMB_SIZE,), jnp.float32) / 10.0,
        "agent_emb": jax.random.normal(ks[1], (EMB_SIZE,), jnp.float32) / 10.0,
        "subgoal_emb": jax.random.normal(ks[2], (EMB_SIZE,), jnp.float32) / 10.0,
        "goal_emb": jax.random.normal(ks[3], (EMB_SIZE,), jnp.float32) / 10.0,
        # goal2_embedding exists in the torch module but is unused when num_goals == 1
        "w1": xavier_uniform(ks[4], in_size, h1),
        "b1": jnp.zeros((1, h1), jnp.float32),
        "w2": xavier_uniform(ks[5], h1, h2),
        "b2": jnp.zeros((1, h2), jnp.float32),
        "w3": xavier_uniform(ks[6], h2, hm),
        "b3": jnp.zeros((1, hm), jnp.float32),
    }


def reference_forward(x, params):
    """Pure-JAX mirror of the torch module (for correctness check)."""
    lead = x.shape[:-1]
    num_objects = x.shape[-1] // OBJECT_SIZE
    x_obj = x.reshape(lead + (num_objects, OBJECT_SIZE))
    non_subgoals = 2 + NUM_GOALS
    emb_list = ([params["own_emb"], params["agent_emb"]]
                + [params["subgoal_emb"]] * (num_objects - non_subgoals)
                + [params["goal_emb"]])
    emb = jnp.broadcast_to(jnp.stack(emb_list, 0), lead + (num_objects, EMB_SIZE))
    inputs = jnp.concatenate([x_obj, emb], axis=-1)
    own = jnp.broadcast_to(inputs[..., 0:1, :], inputs.shape)
    full = jnp.concatenate([own, inputs], axis=-1)
    h = _leaky_relu(full @ params["w1"] + params["b1"][0])
    h = _leaky_relu(h @ params["w2"] + params["b2"][0])
    rel = jnp.sum(h, axis=-2)
    return _leaky_relu(rel @ params["w3"] + params["b3"][0])


if __name__ == "__main__":
    key = jax.random.PRNGKey(0)
    pkey, xkey = jax.random.split(key)
    params = init_params(pkey)

    # leading dims (2, 8), num_objects = 5  ->  last dim = 15
    x = jax.random.normal(xkey, (2, 8, 5 * OBJECT_SIZE), jnp.float32)

    fwd = jax.jit(relation_layer_forward)
    out = jax.block_until_ready(fwd(x, params))

    ref = reference_forward(x, params)
    assert out.shape == (2, 8, MLP_HIDDENS[-1]), out.shape
    assert jnp.allclose(out, ref, atol=1e-4, rtol=1e-4), (
        float(jnp.max(jnp.abs(out - ref))))
    print("KERNEL_OK")
</pallas_src>

<mosaic_0001>
module attributes {stable_mosaic.version = 11 : i64} {
  func.func @relation_kernel(%arg0: i32, %arg1: memref<5x3x128xf32, #tpu.memory_space<vmem>>, %arg2: memref<4x16x16xf32, #tpu.memory_space<vmem>>, %arg3: memref<16x7xf32, #tpu.memory_space<vmem>>, %arg4: memref<16x128xf32, #tpu.memory_space<vmem>>) attributes {dimension_semantics = [#tpu.dimension_semantics<parallel>], iteration_bounds = array<i64: 1>, scalar_prefetch = 0 : i64, scratch_operands = 0 : i64, tpu.core_type = #tpu.core_type<tc>, window_params = [{transform_indices = @transform_0, window_bounds = array<i64: 5, 3, 128>}, {pipeline_mode = #tpu.pipeline_mode<synchronous>, transform_indices = @transform_1, window_bounds = array<i64: 4, 16, 16>}, {pipeline_mode = #tpu.pipeline_mode<synchronous>, transform_indices = @transform_2, window_bounds = array<i64: 16, 7>}, {transform_indices = @transform_3, window_bounds = array<i64: 16, 128>}]} {
    %c0 = arith.constant 0 : index
    %c0_0 = arith.constant 0 : index
    %c0_1 = arith.constant 0 : index
    %0 = vector.load %arg2[%c0, %c0_0, %c0_1] : memref<4x16x16xf32, #tpu.memory_space<vmem>>, vector<1x16x3xf32>
    %1 = vector.shape_cast %0 : vector<1x16x3xf32> to vector<16x3xf32>
    %c1 = arith.constant 1 : index
    %c0_2 = arith.constant 0 : index
    %c0_3 = arith.constant 0 : index
    %2 = vector.load %arg2[%c1, %c0_2, %c0_3] : memref<4x16x16xf32, #tpu.memory_space<vmem>>, vector<1x16x3xf32>
    %3 = vector.shape_cast %2 : vector<1x16x3xf32> to vector<16x3xf32>
    %c2 = arith.constant 2 : index
    %c0_4 = arith.constant 0 : index
    %c0_5 = arith.constant 0 : index
    %4 = vector.load %arg2[%c2, %c0_4, %c0_5] : memref<4x16x16xf32, #tpu.memory_space<vmem>>, vector<1x16x16xf32>
    %5 = vector.shape_cast %4 : vector<1x16x16xf32> to vector<16x16xf32>
    %c3 = arith.constant 3 : index
    %c0_6 = arith.constant 0 : index
    %c0_7 = arith.constant 0 : index
    %6 = vector.load %arg2[%c3, %c0_6, %c0_7] : memref<4x16x16xf32, #tpu.memory_space<vmem>>, vector<1x16x16xf32>
    %7 = vector.shape_cast %6 : vector<1x16x16xf32> to vector<16x16xf32>
    %c0_8 = arith.constant 0 : index
    %c5 = arith.constant 5 : index
    %8 = vector.load %arg3[%c0_8, %c5] : memref<16x7xf32, #tpu.memory_space<vmem>>, vector<16x1xf32>
    %c0_9 = arith.constant 0 : index
    %c6 = arith.constant 6 : index
    %9 = vector.load %arg3[%c0_9, %c6] : memref<16x7xf32, #tpu.memory_space<vmem>>, vector<16x1xf32>
    %c0_10 = arith.constant 0 : index
    %c0_11 = arith.constant 0 : index
    %c0_12 = arith.constant 0 : index
    %10 = vector.load %arg1[%c0_10, %c0_11, %c0_12] : memref<5x3x128xf32, #tpu.memory_space<vmem>>, vector<1x3x128xf32>
    %11 = vector.shape_cast %10 : vector<1x3x128xf32> to vector<3x128xf32>
    %cst = arith.constant dense<0.000000e+00> : vector<16x128xf32>
    %12 = tpu.matmul %1, %11, %cst {dimension_numbers = #tpu.dot_dimension_numbers<[1], [0], [0], [1], [0, 0, 1, 1], [], []>} : vector<16x3xf32>, vector<3x128xf32>, vector<16x128xf32> -> vector<16x128xf32>
    %cst_13 = arith.constant 0.000000e+00 : f32
    %13 = vector.broadcast %cst_13 : f32 to vector<16x128xf32>
    %c0_14 = arith.constant 0 : index
    %c0_15 = arith.constant 0 : index
    %c0_16 = arith.constant 0 : index
    %14 = vector.load %arg1[%c0_14, %c0_15, %c0_16] : memref<5x3x128xf32, #tpu.memory_space<vmem>>, vector<1x3x128xf32>
    %15 = vector.shape_cast %14 : vector<1x3x128xf32> to vector<3x128xf32>
    %cst_17 = arith.constant dense<0.000000e+00> : vector<16x128xf32>
    %16 = tpu.matmul %3, %15, %cst_17 {dimension_numbers = #tpu.dot_dimension_numbers<[1], [0], [0], [1], [0, 0, 1, 1], [], []>} : vector<16x3xf32>, vector<3x128xf32>, vector<16x128xf32> -> vector<16x128xf32>
    %17 = arith.addf %12, %16 : vector<16x128xf32>
    %c0_18 = arith.constant 0 : index
    %c0_19 = arith.constant 0 : index
    %18 = vector.load %arg3[%c0_18, %c0_19] : memref<16x7xf32, #tpu.memory_space<vmem>>, vector<16x1xf32>
    %19 = vector.broadcast %18 : vector<16x1xf32> to vector<16x128xf32>
    %20 = arith.addf %17, %19 : vector<16x128xf32>
    %cst_20 = arith.constant 0.00999999977 : f32
    %21 = vector.broadcast %cst_20 : f32 to vector<16x128xf32>
    %22 = arith.mulf %21, %20 : vector<16x128xf32>
    %23 = arith.maximumf %20, %22 : vector<16x128xf32>
    %cst_21 = arith.constant dense<0.000000e+00> : vector<16x128xf32>
    %24 = tpu.matmul %5, %23, %cst_21 {dimension_numbers = #tpu.dot_dimension_numbers<[1], [0], [0], [1], [0, 0, 1, 1], [], []>} : vector<16x16xf32>, vector<16x128xf32>, vector<16x128xf32> -> vector<16x128xf32>
    %25 = vector.broadcast %8 : vector<16x1xf32> to vector<16x128xf32>
    %26 = arith.addf %24, %25 : vector<16x128xf32>
    %cst_22 = arith.constant 0.00999999977 : f32
    %27 = vector.broadcast %cst_22 : f32 to vector<16x128xf32>
    %28 = arith.mulf %27, %26 : vector<16x128xf32>
    %29 = arith.maximumf %26, %28 : vector<16x128xf32>
    %30 = arith.addf %13, %29 : vector<16x128xf32>
    %c1_23 = arith.constant 1 : index
    %c0_24 = arith.constant 0 : index
    %c0_25 = arith.constant 0 : index
    %31 = vector.load %arg1[%c1_23, %c0_24, %c0_25] : memref<5x3x128xf32, #tpu.memory_space<vmem>>, vector<1x3x128xf32>
    %32 = vector.shape_cast %31 : vector<1x3x128xf32> to vector<3x128xf32>
    %cst_26 = arith.constant dense<0.000000e+00> : vector<16x128xf32>
    %33 = tpu.matmul %3, %32, %cst_26 {dimension_numbers = #tpu.dot_dimension_numbers<[1], [0], [0], [1], [0, 0, 1, 1], [], []>} : vector<16x3xf32>, vector<3x128xf32>, vector<16x128xf32> -> vector<16x128xf32>
    %34 = arith.addf %12, %33 : vector<16x128xf32>
    %c0_27 = arith.constant 0 : index
    %c1_28 = arith.constant 1 : index
    %35 = vector.load %arg3[%c0_27, %c1_28] : memref<16x7xf32, #tpu.memory_space<vmem>>, vector<16x1xf32>
    %36 = vector.broadcast %35 : vector<16x1xf32> to vector<16x128xf32>
    %37 = arith.addf %34, %36 : vector<16x128xf32>
    %cst_29 = arith.constant 0.00999999977 : f32
    %38 = vector.broadcast %cst_29 : f32 to vector<16x128xf32>
    %39 = arith.mulf %38, %37 : vector<16x128xf32>
    %40 = arith.maximumf %37, %39 : vector<16x128xf32>
    %cst_30 = arith.constant dense<0.000000e+00> : vector<16x128xf32>
    %41 = tpu.matmul %5, %40, %cst_30 {dimension_numbers = #tpu.dot_dimension_numbers<[1], [0], [0], [1], [0, 0, 1, 1], [], []>} : vector<16x16xf32>, vector<16x128xf32>, vector<16x128xf32> -> vector<16x128xf32>
    %42 = vector.broadcast %8 : vector<16x1xf32> to vector<16x128xf32>
    %43 = arith.addf %41, %42 : vector<16x128xf32>
    %cst_31 = arith.constant 0.00999999977 : f32
    %44 = vector.broadcast %cst_31 : f32 to vector<16x128xf32>
    %45 = arith.mulf %44, %43 : vector<16x128xf32>
    %46 = arith.maximumf %43, %45 : vector<16x128xf32>
    %47 = arith.addf %30, %46 : vector<16x128xf32>
    %c2_32 = arith.constant 2 : index
    %c0_33 = arith.constant 0 : index
    %c0_34 = arith.constant 0 : index
    %48 = vector.load %arg1[%c2_32, %c0_33, %c0_34] : memref<5x3x128xf32, #tpu.memory_space<vmem>>, vector<1x3x128xf32>
    %49 = vector.shape_cast %48 : vector<1x3x128xf32> to vector<3x128xf32>
    %cst_35 = arith.constant dense<0.000000e+00> : vector<16x128xf32>
    %50 = tpu.matmul %3, %49, %cst_35 {dimension_numbers = #tpu.dot_dimension_numbers<[1], [0], [0], [1], [0, 0, 1, 1], [], []>} : vector<16x3xf32>, vector<3x128xf32>, vector<16x128xf32> -> vector<16x128xf32>
    %51 = arith.addf %12, %50 : vector<16x128xf32>
    %c0_36 = arith.constant 0 : index
    %c2_37 = arith.constant 2 : index
    %52 = vector.load %arg3[%c0_36, %c2_37] : memref<16x7xf32, #tpu.memory_space<vmem>>, vector<16x1xf32>
    %53 = vector.broadcast %52 : vector<16x1xf32> to vector<16x128xf32>
    %54 = arith.addf %51, %53 : vector<16x128xf32>
    %cst_38 = arith.constant 0.00999999977 : f32
    %55 = vector.broadcast %cst_38 : f32 to vector<16x128xf32>
    %56 = arith.mulf %55, %54 : vector<16x128xf32>
    %57 = arith.maximumf %54, %56 : vector<16x128xf32>
    %cst_39 = arith.constant dense<0.000000e+00> : vector<16x128xf32>
    %58 = tpu.matmul %5, %57, %cst_39 {dimension_numbers = #tpu.dot_dimension_numbers<[1], [0], [0], [1], [0, 0, 1, 1], [], []>} : vector<16x16xf32>, vector<16x128xf32>, vector<16x128xf32> -> vector<16x128xf32>
    %59 = vector.broadcast %8 : vector<16x1xf32> to vector<16x128xf32>
    %60 = arith.addf %58, %59 : vector<16x128xf32>
    %cst_40 = arith.constant 0.00999999977 : f32
    %61 = vector.broadcast %cst_40 : f32 to vector<16x128xf32>
    %62 = arith.mulf %61, %60 : vector<16x128xf32>
    %63 = arith.maximumf %60, %62 : vector<16x128xf32>
    %64 = arith.addf %47, %63 : vector<16x128xf32>
    %c3_41 = arith.constant 3 : index
    %c0_42 = arith.constant 0 : index
    %c0_43 = arith.constant 0 : index
    %65 = vector.load %arg1[%c3_41, %c0_42, %c0_43] : memref<5x3x128xf32, #tpu.memory_space<vmem>>, vector<1x3x128xf32>
    %66 = vector.shape_cast %65 : vector<1x3x128xf32> to vector<3x128xf32>
    %cst_44 = arith.constant dense<0.000000e+00> : vector<16x128xf32>
    %67 = tpu.matmul %3, %66, %cst_44 {dimension_numbers = #tpu.dot_dimension_numbers<[1], [0], [0], [1], [0, 0, 1, 1], [], []>} : vector<16x3xf32>, vector<3x128xf32>, vector<16x128xf32> -> vector<16x128xf32>
    %68 = arith.addf %12, %67 : vector<16x128xf32>
    %c0_45 = arith.constant 0 : index
    %c3_46 = arith.constant 3 : index
    %69 = vector.load %arg3[%c0_45, %c3_46] : memref<16x7xf32, #tpu.memory_space<vmem>>, vector<16x1xf32>
    %70 = vector.broadcast %69 : vector<16x1xf32> to vector<16x128xf32>
    %71 = arith.addf %68, %70 : vector<16x128xf32>
    %cst_47 = arith.constant 0.00999999977 : f32
    %72 = vector.broadcast %cst_47 : f32 to vector<16x128xf32>
    %73 = arith.mulf %72, %71 : vector<16x128xf32>
    %74 = arith.maximumf %71, %73 : vector<16x128xf32>
    %cst_48 = arith.constant dense<0.000000e+00> : vector<16x128xf32>
    %75 = tpu.matmul %5, %74, %cst_48 {dimension_numbers = #tpu.dot_dimension_numbers<[1], [0], [0], [1], [0, 0, 1, 1], [], []>} : vector<16x16xf32>, vector<16x128xf32>, vector<16x128xf32> -> vector<16x128xf32>
    %76 = vector.broadcast %8 : vector<16x1xf32> to vector<16x128xf32>
    %77 = arith.addf %75, %76 : vector<16x128xf32>
    %cst_49 = arith.constant 0.00999999977 : f32
    %78 = vector.broadcast %cst_49 : f32 to vector<16x128xf32>
    %79 = arith.mulf %78, %77 : vector<16x128xf32>
    %80 = arith.maximumf %77, %79 : vector<16x128xf32>
    %81 = arith.addf %64, %80 : vector<16x128xf32>
    %c4 = arith.constant 4 : index
    %c0_50 = arith.constant 0 : index
    %c0_51 = arith.constant 0 : index
    %82 = vector.load %arg1[%c4, %c0_50, %c0_51] : memref<5x3x128xf32, #tpu.memory_space<vmem>>, vector<1x3x128xf32>
    %83 = vector.shape_cast %82 : vector<1x3x128xf32> to vector<3x128xf32>
    %cst_52 = arith.constant dense<0.000000e+00> : vector<16x128xf32>
    %84 = tpu.matmul %3, %83, %cst_52 {dimension_numbers = #tpu.dot_dimension_numbers<[1], [0], [0], [1], [0, 0, 1, 1], [], []>} : vector<16x3xf32>, vector<3x128xf32>, vector<16x128xf32> -> vector<16x128xf32>
    %85 = arith.addf %12, %84 : vector<16x128xf32>
    %c0_53 = arith.constant 0 : index
    %c4_54 = arith.constant 4 : index
    %86 = vector.load %arg3[%c0_53, %c4_54] : memref<16x7xf32, #tpu.memory_space<vmem>>, vector<16x1xf32>
    %87 = vector.broadcast %86 : vector<16x1xf32> to vector<16x128xf32>
    %88 = arith.addf %85, %87 : vector<16x128xf32>
    %cst_55 = arith.constant 0.00999999977 : f32
    %89 = vector.broadcast %cst_55 : f32 to vector<16x128xf32>
    %90 = arith.mulf %89, %88 : vector<16x128xf32>
    %91 = arith.maximumf %88, %90 : vector<16x128xf32>
    %cst_56 = arith.constant dense<0.000000e+00> : vector<16x128xf32>
    %92 = tpu.matmul %5, %91, %cst_56 {dimension_numbers = #tpu.dot_dimension_numbers<[1], [0], [0], [1], [0, 0, 1, 1], [], []>} : vector<16x16xf32>, vector<16x128xf32>, vector<16x128xf32> -> vector<16x128xf32>
    %93 = vector.broadcast %8 : vector<16x1xf32> to vector<16x128xf32>
    %94 = arith.addf %92, %93 : vector<16x128xf32>
    %cst_57 = arith.constant 0.00999999977 : f32
    %95 = vector.broadcast %cst_57 : f32 to vector<16x128xf32>
    %96 = arith.mulf %95, %94 : vector<16x128xf32>
    %97 = arith.maximumf %94, %96 : vector<16x128xf32>
    %98 = arith.addf %81, %97 : vector<16x128xf32>
    %cst_58 = arith.constant dense<0.000000e+00> : vector<16x128xf32>
    %99 = tpu.matmul %7, %98, %cst_58 {dimension_numbers = #tpu.dot_dimension_numbers<[1], [0], [0], [1], [0, 0, 1, 1], [], []>} : vector<16x16xf32>, vector<16x128xf32>, vector<16x128xf32> -> vector<16x128xf32>
    %100 = vector.broadcast %9 : vector<16x1xf32> to vector<16x128xf32>
    %101 = arith.addf %99, %100 : vector<16x128xf32>
    %cst_59 = arith.constant 0.00999999977 : f32
    %102 = vector.broadcast %cst_59 : f32 to vector<16x128xf32>
    %103 = arith.mulf %102, %101 : vector<16x128xf32>
    %104 = arith.maximumf %101, %103 : vector<16x128xf32>
    %c0_60 = arith.constant 0 : index
    %c0_61 = arith.constant 0 : index
    %105 = vector.load %arg4[%c0_60, %c0_61] : memref<16x128xf32, #tpu.memory_space<vmem>>, vector<16x128xf32>
    tpu.vector_store %arg4[%c0_60, %c0_61], %104 {strides = array<i32>} : memref<16x128xf32, #tpu.memory_space<vmem>>, vector<16x128xf32>,
    return
  }
  func.func @transform_0(%arg0: i32) -> (i32, i32, i32) {
    %c0_i32 = arith.constant 0 : i32
    %c0_i32_0 = arith.constant 0 : i32
    %c0_i32_1 = arith.constant 0 : i32
    return %c0_i32, %c0_i32_0, %arg0 : i32, i32, i32
  }
  func.func @transform_1(%arg0: i32) -> (i32, i32, i32) {
    %c0_i32 = arith.constant 0 : i32
    %c0_i32_0 = arith.constant 0 : i32
    %c0_i32_1 = arith.constant 0 : i32
    %c0_i32_2 = arith.constant 0 : i32
    return %c0_i32, %c0_i32_0, %c0_i32_1 : i32, i32, i32
  }
  func.func @transform_2(%arg0: i32) -> (i32, i32) {
    %c0_i32 = arith.constant 0 : i32
    %c0_i32_0 = arith.constant 0 : i32
    %c0_i32_1 = arith.constant 0 : i32
    return %c0_i32, %c0_i32_0 : i32, i32
  }
  func.func @transform_3(%arg0: i32) -> (i32, i32) {
    %c0_i32 = arith.constant 0 : i32
    %c0_i32_0 = arith.constant 0 : i32
    return %c0_i32, %arg0 : i32, i32
  }
}

</mosaic_0001>

<bundles_post_ra>
// kernel: relation_layer_forward.1
= control target key start
LH: loop header
LB: loop body
LE: loop exit
PB: predicated region body
PF: predicated region fallthrough
CT: control target
= control target key end

     0   :  { %vm35_vm0 = vcmask 1042432   ;;  %vm28_vm1 = vcmask 23552   ;;  %v551_v3 = vmov 0   ;;  %v552_v4 = vmov 2   ;;  %s712_s0 = inlined_call_operand.vmem [shape: f32[5,3,128], index: 0, kind: input, shape index: {}]   ;;  %s713_s1 = inlined_call_operand.vmem [shape: f32[4,16,16], index: 1, kind: input, shape index: {}]   ;;  %s714_s2 = inlined_call_operand.vmem [shape: f32[16,7], index: 2, kind: input, shape index: {}]   ;;  %s715_s3 = inlined_call_operand.vmem [shape: f32[16,128], index: 3, kind: output, shape index: {}]  }
   0x1   :  { %v27_v0 = vld [vmem:[%s712_s0] sm:$0x7]  ;;  %v506_v1 = vld [vmem:[%s712_s0 + $0x4] sm:$0x7]  ;;  %539 = vset.pattern.permute.xlu0 %v551_v3  ;;  %540 = vset.pattern.permute.xlu1 %v552_v4  ;;  %v592_v5 = vld [vmem:[%s713_s1 + $0x10] sm:$0xff]  ;;  %v553_v9 = vmov 1  }
   0x2   :  { %v14_v2 = vld [vmem:[%s713_s1] sm:$0xff]  ;;  %498 = vmatpush.msk.msra.mxu0 %vm35_vm0, %v27_v0  ;;  %501 = vmatpush.msk.msra.mxu1 %vm35_vm0, %v27_v0  ;;  %v597_v6 = vld [vmem:[%s714_s2 + $0x8] sm:$0xff]  ;;  %v524_v8 = vld [vmem:[%s712_s0 + $0x10] sm:$0x7]  ;;  %v554_v13 = vmov 4   ;;  %v555_v18 = vmov 5  }
   0x3   :  { %507 = vmatpush.msk.msra.mxu3 %vm35_vm0, %v506_v1  ;;  %499 = vmatmul.msk.f32.vlgmr.msra.gmra.mxu0 %vm28_vm1, %v14_v2  ;;  %v512_v7 = vld [vmem:[%s712_s0 + $0x8] sm:$0x7]  ;;  %v622_v11 = vld [vmem:[%s713_s1 + $0x18] sm:$0xff]  ;;  %v627_v12 = vld [vmem:[%s714_s2] sm:$0xff]  ;;  %vm117_vm2 = vcmask 130048   ;;  %v556_v43 = vmov 3  }
   0x4   :  { %502 = vmatmul.msk.f32.vlgmr.msra.gmra.mxu1 %vm28_vm1, %v592_v5  ;;  %508 = vmatmul.msk.f32.vlgmr.msra.gmra.mxu3 %vm28_vm1, %v592_v5  ;;  %v15_v10 = vld [vmem:[%s713_s1 + $0x8] sm:$0xff]  ;;  %v659_v39 = vld [vmem:[%s713_s1 + $0x20] sm:$0xff] }
   0x5   :  { %100 = vperm.xlu0 %539, %v597_v6   ;;  %513 = vmatpush.msk.msrb.mxu1 %vm35_vm0, %v512_v7  ;;  %v518_v40 = vld [vmem:[%s712_s0 + $0xc] sm:$0x7] }
   0x6   :  { %261 = vperm.xlu1 %540, %v597_v6   ;;  %541 = vset.pattern.permute.xlu2 %v553_v9  ;;  %v495_v51 = vld [vmem:[%s713_s1 + $0x28] sm:$0xff] }
   0x7   :  { %525 = vmatpush.msk.msra.mxu1 %vm35_vm0, %v524_v8  ;;  %188 = vperm.xlu2 %541, %v597_v6  }
   0xb   :  { %500 = vmatmul.msk.f32.gmra.mxu0 %vm28_vm1, %v15_v10 }
   0xc   :  { %503 = vmatmul.msk.f32.gmra.mxu1 %vm28_vm1, %v622_v11  ;;  %509 = vmatmul.msk.f32.gmra.mxu3 %vm28_vm1, %v622_v11 }
   0xd   :  { %95 = vperm.xlu0 %539, %v627_v12  }
   0xe   :  { %257 = vperm.xlu1 %540, %v627_v12  }
   0xf   :  { %184 = vperm.xlu2 %541, %v627_v12  }
  0x14   :  { %514 = vmatmul.msk.f32.vlgmr.msrb.gmra.mxu1 %vm28_vm1, %v592_v5 }
  0x15   :  { %542 = vset.pattern.permute.xlu0 %v554_v13 }
  0x16   :  { %543 = vset.pattern.permute.xlu1 %v554_v13  ;;  %407 = vperm.xlu0 %542, %v597_v6  }
  0x17   :  { %403 = vperm.xlu1 %543, %v627_v12   ;;  %544 = vset.pattern.permute.xlu2 %v556_v43 }
  0x18   :  { %334 = vperm.xlu2 %544, %v597_v6  }
  0x1c   :  { %515 = vmatmul.msk.f32.gmra.mxu1 %vm28_vm1, %v622_v11 }
  0x1e   :  { %547 = vset.pattern.permute.xlu0 %v555_v18 }
  0x1f   :  { %110 = vperm.xlu0 %547, %v627_v12   ;;  %545 = vset.pattern.permute.xlu1 %v556_v43 }
  0x20   :  { %330 = vperm.xlu1 %545, %v627_v12   ;;  %546 = vset.pattern.permute.xlu2 %v555_v18 }
  0x21   :  { %114 = vperm.xlu2 %546, %v597_v6  }
  0x24   :  { %526 = vmatmul.msk.f32.vlgmr.msra.gmra.mxu1 %vm28_vm1, %v592_v5 }
  0x2c   :  { %527 = vmatmul.msk.f32.gmra.mxu1 %vm28_vm1, %v622_v11 }
  0x61   :  { %v189_v17 = vpop.permute.xlu2 %188 }
  0x69   :  { %v185_v28 = vpop.permute.xlu2 %184 }
  0x77   :  { %v101_v14 = vpop.permute.xlu0 %100 }
  0x78   :  { %v262_v29 = vpop.permute.xlu1 %261 }
  0x7f   :  { %v96_v20 = vpop.permute.xlu0 %95 }
  0x80   :  { %v647_v15 = vpop.f32.mrf.mxu0  ;;  %v258_v46 = vpop.permute.xlu1 %257 }
  0x81   :  { %v85_v16 = vpop.f32.mrf.mxu1 }
  0x82   :  { %v91_v19 = vadd.f32 %v85_v16, %v647_v15  ;;  %v335_v16 = vpop.permute.xlu2 %334 }
  0x84   :  { %v103_v24 = vadd.f32 %v96_v20, %v91_v19 }
  0x86   :  { %v105_v30 = vmul.f32 0.01, %v103_v24 }
  0x87   :  { %v175_v21 = vpop.f32.mrf.mxu3 }
  0x88   :  { %v651_v22 = vpop.f32.mrf.mxu0  ;;  %v181_v26 = vadd.f32 %v175_v21, %v647_v15  ;;  %v107_v38 = vmax.f32 %v103_v24, %v105_v30  ;;  %v408_v61 = vpop.permute.xlu0 %407 }
  0x89   :  { %v88_v23 = vpop.f32.mrf.mxu1  ;;  %v404_v59 = vpop.permute.xlu1 %403 }
  0x8a   :  { %v92_v25 = vadd.f32 %v88_v23, %v651_v22  ;;  %v191_v33 = vadd.f32 %v185_v28, %v181_v26 }
  0x8c   :  { %v104_v27 = vadd.f32 %v101_v14, %v92_v25  ;;  %v193_v41 = vmul.f32 0.01, %v191_v33 }
  0x8e   :  { %v106_v31 = vmul.f32 0.01, %v104_v27  ;;  %v195_v47 = vmax.f32 %v191_v33, %v193_v41 }
  0x8f   :  { %v178_v32 = vpop.f32.mrf.mxu3 }
  0x90   :  { %v182_v34 = vadd.f32 %v178_v32, %v651_v22  ;;  %v108_v35 = vmax.f32 %v104_v27, %v106_v31  ;;  %v557_v32 = vmov 6  }
  0x91   :  { %v248_v36 = vpop.f32.mrf.mxu1  ;;  %v111_v27 = vpop.permute.xlu0 %110  ;;  %548 = vset.pattern.permute.xlu1 %v557_v32  ;;  %549 = vset.pattern.permute.xlu2 %v557_v32 }
  0x92   :  { %v192_v37 = vadd.f32 %v189_v17, %v182_v34  ;;  %138 = vmatpush.msra.mxu2 %v108_v35  ;;  %v254_v44 = vadd.f32 %v248_v36, %v647_v15  ;;  %v331_v10 = vpop.permute.xlu1 %330  ;;  %446 = vperm.xlu1 %548, %v627_v12  }
  0x93   :  { %450 = vperm.xlu2 %549, %v597_v6   ;;  %550 = vset.pattern.permute.xlu0 %v557_v32 }
  0x94   :  { %139 = vmatpush.msra.mxu2 %v107_v38  ;;  %v194_v42 = vmul.f32 0.01, %v192_v37  ;;  %v264_v49 = vadd.f32 %v258_v46, %v254_v44 }
  0x95   :  { %504 = vmatmul.msk.f32.vlgmr.msra.gmra.mxu2 %vm117_vm2, %v659_v39 }
  0x96   :  { %v196_v45 = vmax.f32 %v192_v37, %v194_v42  ;;  %519 = vmatpush.msk.msrb.mxu2 %vm35_vm0, %v518_v40  ;;  %v266_v53 = vmul.f32 0.01, %v264_v49 }
  0x98   :  { %211 = vmatpush.msrb.mxu0 %v196_v45  ;;  %v268_v57 = vmax.f32 %v264_v49, %v266_v53 }
  0x99   :  { %v251_v48 = vpop.f32.mrf.mxu1 }
  0x9a   :  { %v255_v50 = vadd.f32 %v251_v48, %v651_v22  ;;  %212 = vmatpush.msrb.mxu0 %v195_v47 }
  0x9b   :  { %510 = vmatmul.msk.f32.vlgmr.msrb.gmra.mxu0 %vm117_vm2, %v659_v39 }
  0x9c   :  { %v265_v52 = vadd.f32 %v262_v29, %v255_v50 }
  0x9d   :  { %505 = vmatmul.msk.f32.gmra.mxu2 %vm117_vm2, %v495_v51 }
  0x9e   :  { %v267_v54 = vmul.f32 0.01, %v265_v52 }
  0xa0   :  { %v269_v55 = vmax.f32 %v265_v52, %v267_v54 }
  0xa1   :  { %v394_v56 = vpop.f32.mrf.mxu1 }
  0xa2   :  { %284 = vmatpush.msrb.mxu3 %v269_v55  ;;  %v400_v58 = vadd.f32 %v394_v56, %v647_v15 }
  0xa3   :  { %511 = vmatmul.msk.f32.gmra.mxu0 %vm117_vm2, %v495_v51 }
  0xa4   :  { %285 = vmatpush.msrb.mxu3 %v268_v57  ;;  %v410_v62 = vadd.f32 %v404_v59, %v400_v58 }
  0xa5   :  { %516 = vmatmul.msk.f32.vlgmr.msrb.gmra.mxu3 %vm117_vm2, %v659_v39  ;;  %520 = vmatmul.msk.f32.vlgmr.msrb.gmra.mxu2 %vm28_vm1, %v592_v5 }
  0xa6   :  { %v412_v1 = vmul.f32 0.01, %v410_v62 }
  0xa8   :  { %v414_v4 = vmax.f32 %v410_v62, %v412_v1 }
  0xa9   :  { %v397_v60 = vpop.f32.mrf.mxu1 }
  0xaa   :  { %v401_v63 = vadd.f32 %v397_v60, %v651_v22 }
  0xac   :  { %v411_v0 = vadd.f32 %v408_v61, %v401_v63 }
  0xad   :  { %517 = vmatmul.msk.f32.gmra.mxu3 %vm117_vm2, %v495_v51  ;;  %521 = vmatmul.msk.f32.gmra.mxu2 %vm28_vm1, %v622_v11 }
  0xae   :  { %v413_v2 = vmul.f32 0.01, %v411_v0 }
  0xb0   :  { %v415_v3 = vmax.f32 %v411_v0, %v413_v2 }
  0xb2   :  { %430 = vmatpush.msra.mxu3 %v415_v3 }
  0xb4   :  { %431 = vmatpush.msra.mxu3 %v414_v4  ;;  %v496_v4 = vld [vmem:[%s713_s1 + $0x30] sm:$0xff] }
  0xb5   :  { %528 = vmatmul.msk.f32.vlgmr.msra.gmra.mxu3 %vm117_vm2, %v659_v39 }
  0xbd   :  { %529 = vmatmul.msk.f32.gmra.mxu3 %vm117_vm2, %v495_v51 }
 0x118   :  { %v141_v5 = vpop.f32.mrf.mxu2 }
 0x119   :  { %v142_v28 = vadd.f32 %v141_v5, %v111_v27  ;;  %v497_v5 = vld [vmem:[%s713_s1 + $0x38] sm:$0xff] }
 0x11b   :  { %v147_v36 = vmul.f32 0.01, %v142_v28 }
 0x11d   :  { %v149_v44 = vmax.f32 %v142_v28, %v147_v36 }
 0x120   :  { %v144_v7 = vpop.f32.mrf.mxu2 }
 0x128   :  { %v321_v8 = vpop.f32.mrf.mxu2  ;;  %v287_v23 = vpop.f32.mrf.mxu3 }
 0x129   :  { %v327_v9 = vadd.f32 %v321_v8, %v647_v15  ;;  %v214_v15 = vpop.f32.mrf.mxu0  ;;  %v288_v34 = vadd.f32 %v287_v23, %v111_v27 }
 0x12a   :  { %v215_v29 = vadd.f32 %v214_v15, %v111_v27 }
 0x12b   :  { %v337_v14 = vadd.f32 %v331_v10, %v327_v9  ;;  %v293_v42 = vmul.f32 0.01, %v288_v34 }
 0x12c   :  { %v220_v37 = vmul.f32 0.01, %v215_v29 }
 0x12d   :  { %v339_v18 = vmul.f32 0.01, %v337_v14  ;;  %v295_v50 = vmax.f32 %v288_v34, %v293_v42 }
 0x12e   :  { %v222_v45 = vmax.f32 %v215_v29, %v220_v37 }
 0x12f   :  { %v341_v21 = vmax.f32 %v337_v14, %v339_v18 }
 0x130   :  { %v324_v13 = vpop.f32.mrf.mxu2  ;;  %v290_v24 = vpop.f32.mrf.mxu3  ;;  %v224_v53 = vadd.f32 %v222_v45, %v149_v44 }
 0x131   :  { %v328_v11 = vadd.f32 %v324_v13, %v651_v22  ;;  %v217_v25 = vpop.f32.mrf.mxu0  ;;  %v115_v22 = vpop.permute.xlu2 %114 }
 0x132   :  { %v145_v30 = vadd.f32 %v144_v7, %v115_v22  ;;  %v218_v31 = vadd.f32 %v217_v25, %v115_v22  ;;  %v291_v35 = vadd.f32 %v290_v24, %v115_v22  ;;  %v297_v58 = vadd.f32 %v295_v50, %v224_v53  ;;  %v447_v7 = vpop.permute.xlu1 %446 }
 0x133   :  { %v338_v17 = vadd.f32 %v335_v16, %v328_v11 }
 0x134   :  { %v148_v38 = vmul.f32 0.01, %v145_v30  ;;  %v294_v43 = vmul.f32 0.01, %v291_v35 }
 0x135   :  { %v340_v19 = vmul.f32 0.01, %v338_v17 }
 0x136   :  { %v150_v46 = vmax.f32 %v145_v30, %v148_v38  ;;  %v296_v6 = vmax.f32 %v291_v35, %v294_v43 }
 0x137   :  { %v342_v20 = vmax.f32 %v338_v17, %v340_v19 }
 0x138   :  { %v433_v26 = vpop.f32.mrf.mxu3 }
 0x139   :  { %357 = vmatpush.msra.mxu0 %v342_v20  ;;  %v451_v14 = vpop.permute.xlu2 %450 }
 0x13b   :  { %358 = vmatpush.msra.mxu0 %v341_v21 }
 0x13c   :  { %522 = vmatmul.msk.f32.vlgmr.msra.gmra.mxu0 %vm117_vm2, %v659_v39  ;;  %v221_v39 = vmul.f32 0.01, %v218_v31 }
 0x13e   :  { %v223_v47 = vmax.f32 %v218_v31, %v221_v39 }
 0x140   :  { %v436_v41 = vpop.f32.mrf.mxu3  ;;  %v225_v54 = vadd.f32 %v223_v47, %v150_v46 }
 0x141   :  { %v437_v49 = vadd.f32 %v436_v41, %v115_v22 }
 0x142   :  { %v298_v59 = vadd.f32 %v296_v6, %v225_v54 }
 0x143   :  { %v440_v56 = vmul.f32 0.01, %v437_v49 }
 0x144   :  { %523 = vmatmul.msk.f32.gmra.mxu0 %vm117_vm2, %v495_v51  ;;  %v434_v51 = vadd.f32 %v433_v26, %v111_v27 }
 0x145   :  { %v442_v63 = vmax.f32 %v437_v49, %v440_v56 }
 0x146   :  { %v439_v60 = vmul.f32 0.01, %v434_v51 }
 0x148   :  { %v441_v1 = vmax.f32 %v434_v51, %v439_v60 }
 0x1b9   :  { %v360_v33 = vpop.f32.mrf.mxu0 }
 0x1ba   :  { %v361_v40 = vadd.f32 %v360_v33, %v111_v27 }
 0x1bc   :  { %v366_v48 = vmul.f32 0.01, %v361_v40 }
 0x1be   :  { %v368_v55 = vmax.f32 %v361_v40, %v366_v48 }
 0x1c0   :  { %v370_v62 = vadd.f32 %v368_v55, %v297_v58 }
 0x1c1   :  { %v363_v12 = vpop.f32.mrf.mxu0 }
 0x1c2   :  { %v364_v52 = vadd.f32 %v363_v12, %v115_v22  ;;  %v443_v3 = vadd.f32 %v441_v1, %v370_v62 }
 0x1c4   :  { %v367_v57 = vmul.f32 0.01, %v364_v52 }
 0x1c6   :  { %v369_v61 = vmax.f32 %v364_v52, %v367_v57 }
 0x1c8   :  { %v371_v0 = vadd.f32 %v369_v61, %v298_v59 }
 0x1ca   :  { %v444_v2 = vadd.f32 %v442_v63, %v371_v0 }
 0x1cc   :  { %473 = vmatpush.msra.mxu2 %v444_v2 }
 0x1ce   :  { %474 = vmatpush.msra.mxu2 %v443_v3 }
 0x1cf   :  { %530 = vmatmul.msk.f32.vlgmr.msra.gmra.mxu2 %vm117_vm2, %v496_v4 }
 0x1d7   :  { %531 = vmatmul.msk.f32.gmra.mxu2 %vm117_vm2, %v497_v5 }
 0x252   :  { %v476_v8 = vpop.f32.mrf.mxu2 }
 0x253   :  { %v477_v9 = vadd.f32 %v476_v8, %v447_v7 }
 0x255   :  { %v482_v10 = vmul.f32 0.01, %v477_v9 }
 0x257   :  { %v484_v13 = vmax.f32 %v477_v9, %v482_v10 }
 0x259   :  { %486 = vst [vmem:[%s715_s3] sm:$0xff] %v484_v13 }
 0x25a   :  { %v479_v11 = vpop.f32.mrf.mxu2 }
 0x25b   :  { %v480_v16 = vadd.f32 %v479_v11, %v451_v14 }
 0x25d   :  { %v483_v17 = vmul.f32 0.01, %v480_v16 }
 0x25f   :  { %v485_v18 = vmax.f32 %v480_v16, %v483_v17 }
 0x261   :  { %487 = vst [vmem:[%s715_s3 + $0x8] sm:$0xff] %v485_v18 }

</bundles_post_ra>
